<compile_context>
chip_gen: v6e
topology: v6e:2x2x1
jax: 0.10.0
libtpu: 0.0.40
codegen_flags: <defaults>
</compile_context>

<pallas_src>
import jax
import jax.numpy as jnp
import numpy as np
from jax.experimental import pallas as pl
from jax.experimental.pallas import tpu as pltpu


# -----------------------------------------------------------------------------
# VMEM sizing helpers
# -----------------------------------------------------------------------------
def _physical_vmem_bytes():
    """Per-TensorCore VMEM capacity; falls back to 64 MiB (v7x, the smallest)."""
    try:
        info = pltpu.get_tpu_info()
        cap = int(getattr(info, "vmem_capacity_bytes", 0))
        if cap > 0:
            return cap
    except Exception:
        pass
    return 64 * 1024 * 1024


def _pick_sentence_tile(S, T, H, E, *, min_grid_steps=8, max_tile=128):
    """Sentence-tile size + vmem limit.

    Sized from the real per-sentence residency of the MXU-based kernel
    (double-buffered bf16 input tile dominates), capped so the grid keeps at
    least ~min_grid_steps steps (megacore on v7x + pipeline depth), and capped
    at max_tile sentences.
    """
    cap = _physical_vmem_bytes()
    tile_budget = min(int(cap * 0.65), 80 * 1024 * 1024)   # v7x ~41 MiB, v6e/v5e ~80 MiB
    vmem_limit = min(int(cap * 0.82), 100 * 1024 * 1024)    # v7x ~52 MiB, v6e/v5e ~100 MiB

    bytes_per_sentence = (
        2 * (T * H * 2)              # double-buffered bf16 token tile (dominant)
        + 2 * (T * 4)                # double-buffered f32 mask-bias tile
        + 2 * (H * 4 + E * 4 + 4)    # double-buffered emb/loss outputs + labels
        + 10 * H * 4 + 8 * T * 4     # in-kernel f32/bf16 temporaries (p, att, normed, ...)
    )
    cap_vmem = tile_budget // max(bytes_per_sentence, 1)
    cap_steps = pl.cdiv(S, min_grid_steps)   # keep >= min_grid_steps grid steps
    ts = int(max(8, min(cap_vmem, cap_steps, max_tile)))
    ts = (ts // 8) * 8                       # sublane-aligned
    return max(ts, 8), vmem_limit


# -----------------------------------------------------------------------------
# Fused kernel: AttentiveReducer (+ LayerNorm) and the per-event binary CE.
#   inputs per grid step i (sentence tile of size TS):
#     x [TS,T,H] bf16, bias [TS,1,T] f32 (additive mask), q [1,1,H] bf16
#     (pre-scaled by 1/sqrt(H)), gamma/beta [1,H] f32, w_diff [H,E] f32,
#     b_diff [1,E] f32, labels [TS,E] int32
#   outputs: sent_emb [TS,H] f32, per-sentence CE summed over events [TS,1] f32
# -----------------------------------------------------------------------------
def _dcfee_fused_kernel(x_ref, bias_ref, q_ref, g_ref, b_ref, wd_ref, bd_ref,
                        lab_ref, emb_ref, loss_ref):
    x = x_ref[...]                                              # [TS, T, H] bf16
    ts, _, h = x.shape

    # ---- AttentiveReducer: masked scaled dot-product attention (MXU, bf16) ----
    q3 = jnp.broadcast_to(q_ref[...], (ts, 1, h))               # [TS,1,H] bf16
    s3 = jnp.einsum('bqd,bkd->bqk', q3, x,
                    preferred_element_type=jnp.float32)         # [TS,1,T] f32
    s3 = s3 + bias_ref[...]                                     # additive -1e9 mask bias
    smax = jnp.max(s3, axis=-1, keepdims=True)
    p = jnp.exp(s3 - smax)                                      # f32 softmax stats
    # approx reciprocal: uniform scale error cancels exactly in the LayerNorm below
    p = p * pl.reciprocal(jnp.sum(p, axis=-1, keepdims=True), approx=True)
    att3 = jnp.einsum('bqk,bkd->bqd', p.astype(x.dtype), x,
                      preferred_element_type=jnp.float32)       # [TS,1,H] f32
    att = att3.reshape(ts, h)                                   # [TS, H]

    # ---- LayerNorm (annotated-transformer style: unbiased var, eps on std) ----
    # TODO(synk): matches the DEE AttentiveReducer's custom LayerNorm (torch .std
    #             is unbiased, eps added to std), not torch.nn.LayerNorm.
    mean = jnp.mean(att, axis=-1, keepdims=True)
    var = jnp.sum((att - mean) ** 2, axis=-1, keepdims=True) / jnp.float32(h - 1)
    inv_std = pl.reciprocal(jnp.sqrt(var) + jnp.float32(1e-6), approx=False)
    normed = g_ref[...] * (att - mean) * inv_std + b_ref[...]   # [TS, H] f32
    # TODO(synk): nn.Dropout is identity in deterministic eval; omitted.
    emb_ref[...] = normed.astype(emb_ref.dtype)

    # ---- fused event classifiers: 2-class CE via logit-diff + softplus --------
    d = jnp.dot(normed, wd_ref[...],
                preferred_element_type=jnp.float32) + bd_ref[...]   # [TS, E]
    sign = (1 - 2 * lab_ref[...]).astype(jnp.float32)           # label 0 -> +1, 1 -> -1
    z = sign * d
    ce = jnp.maximum(z, 0.0) + jnp.log(1.0 + jnp.exp(-jnp.abs(z)))  # softplus(z)
    loss_ref[...] = jnp.sum(ce, axis=-1, keepdims=True)         # [TS, 1]


def dcfee_sent_emb_and_event_loss(token_emb, token_masks, labels,
                                  q_w, ln_gamma, ln_beta, ev_w, ev_b):
    """One launch over all sentences of the batch.

    Returns (sent_emb [S,H] f32, per-sentence event CE summed over events [S] f32).
    """
    S, T, H = token_emb.shape
    E = labels.shape[-1]
    TS, vmem_limit = _pick_sentence_tile(S, T, H, E)
    S_pad = pl.cdiv(S, TS) * TS
    grid = (S_pad // TS,)

    x = token_emb.astype(jnp.bfloat16)
    # additive mask bias: 0 where valid, -1e9 where padded (token or sentence pad)
    bias = ((token_masks.astype(jnp.float32) - 1.0) * 1e9).reshape(S, 1, T)
    labels = labels.astype(jnp.int32)
    if S_pad != S:
        pad = S_pad - S
        x = jnp.pad(x, ((0, pad), (0, 0), (0, 0)))
        bias = jnp.pad(bias, ((0, pad), (0, 0), (0, 0)), constant_values=-1e9)
        labels = jnp.pad(labels, ((0, pad), (0, 0)))

    # Fold the 1/sqrt(H) attention scale into q once (outside the grid loop);
    # q is an MXU operand, so feed it as bf16.
    q_scaled = (q_w.astype(jnp.float32) / jnp.sqrt(jnp.float32(H))
                ).astype(jnp.bfloat16).reshape(1, 1, H)
    # Binary-CE reformulation: only the logit difference per event is needed.
    # NOTE: assumes the per-event Linear(H,2) weights are packed column-interleaved
    #       as [H, 2*E] (class0_e, class1_e side by side), consistent with the test.
    w_diff = (ev_w[:, 1::2] - ev_w[:, 0::2]).astype(jnp.float32)   # [H, E]
    b_diff = (ev_b[:, 1::2] - ev_b[:, 0::2]).astype(jnp.float32)   # [1, E]
    gamma = ln_gamma.astype(jnp.float32)
    beta = ln_beta.astype(jnp.float32)

    sent_emb, sent_event_loss = pl.pallas_call(
        _dcfee_fused_kernel,
        out_shape=(jax.ShapeDtypeStruct((S_pad, H), jnp.float32),
                   jax.ShapeDtypeStruct((S_pad, 1), jnp.float32)),
        grid=grid,
        in_specs=[
            pl.BlockSpec((TS, T, H), lambda i: (i, 0, 0)),   # token embeddings (bf16)
            pl.BlockSpec((TS, 1, T), lambda i: (i, 0, 0)),   # additive mask bias
            pl.BlockSpec((1, 1, H), lambda i: (0, 0, 0)),    # q (pre-scaled, bf16)
            pl.BlockSpec((1, H), lambda i: (0, 0)),          # LN gamma
            pl.BlockSpec((1, H), lambda i: (0, 0)),          # LN beta
            pl.BlockSpec((H, E), lambda i: (0, 0)),          # event weight diffs
            pl.BlockSpec((1, E), lambda i: (0, 0)),          # event bias diffs
            pl.BlockSpec((TS, E), lambda i: (i, 0)),         # sentence labels
        ],
        out_specs=[
            pl.BlockSpec((TS, H), lambda i: (i, 0)),
            pl.BlockSpec((TS, 1), lambda i: (i, 0)),
        ],
        compiler_params=pltpu.CompilerParams(
            dimension_semantics=("parallel",),               # megacore on v7x
            vmem_limit_bytes=vmem_limit),
    )(x, bias, q_scaled, gamma, beta, w_diff, b_diff, labels)
    return sent_emb[:S], sent_event_loss[:S, 0]


# -----------------------------------------------------------------------------
# DCFEE forward (train_flag=True path): mix loss over the batch of documents.
# -----------------------------------------------------------------------------
def dcfee_forward(ner_token_emb, ner_token_masks, valid_sent_num_list,
                  doc_sent_labels_list, doc_sent_loss_list, params, config):
    # get_batch_sent_emb + per-sentence part of get_loss_on_doc: one fused launch.
    labels_all = jnp.concatenate(
        [l.astype(jnp.int32) for l in doc_sent_labels_list], axis=0)       # [S, E]
    sent_emb, sent_event_loss = dcfee_sent_emb_and_event_loss(
        ner_token_emb, ner_token_masks, labels_all,
        params["att_fc_w"], params["ln_gamma"], params["ln_beta"],
        params["ev_w"], params["ev_b"])

    # Per-document event losses: one segment_sum over the sentence axis.
    batch_size = len(valid_sent_num_list)
    seg_ids = jnp.asarray(
        np.repeat(np.arange(batch_size), np.asarray(valid_sent_num_list)),
        dtype=jnp.int32)
    doc_event_loss = jax.ops.segment_sum(sent_event_loss, seg_ids,
                                         num_segments=batch_size)          # [B]
    doc_event_loss_list = [doc_event_loss[bi] for bi in range(batch_size)]

    # get_mix_loss (plain JAX glue).
    # TODO(synk): per-sentence NER losses come from the external NERModel; a
    #             placeholder tensor is passed in, and missed_sent_idx loss_gamma
    #             scaling (doc_span_info-dependent Python) uses scaling=1 everywhere.
    lambda_1 = config["loss_lambda"]
    lambda_2 = 1.0 - lambda_1
    doc_ner_loss = sum(jnp.sum(l) for l in doc_sent_loss_list)
    mix_loss = (1.0 / batch_size) * (lambda_1 * doc_ner_loss
                                     + lambda_2 * jnp.sum(doc_event_loss))
    return mix_loss, sent_emb, doc_event_loss_list


# -----------------------------------------------------------------------------
# Pure-JAX references (correctness check)
# -----------------------------------------------------------------------------
def ref_sent_emb(x, m, q, g, b):
    H = x.shape[-1]
    scores = jnp.einsum("sth,h->st", x, q[0]) / jnp.sqrt(jnp.float32(H))
    scores = jnp.where(m == 0.0, -1e9, scores)
    p = jax.nn.softmax(scores, axis=-1)
    att = jnp.einsum("st,sth->sh", p, x)
    mean = att.mean(-1, keepdims=True)
    std = jnp.sqrt(((att - mean) ** 2).sum(-1, keepdims=True) / (H - 1))
    return g * (att - mean) / (std + 1e-6) + b


def ref_event_loss(emb, wp, bp, labels, E):
    logits = emb @ wp + bp
    tot = jnp.float32(0.0)
    for e in range(E):
        lp = jax.nn.log_softmax(logits[:, 2 * e:2 * e + 2], axis=-1)
        picked = jnp.take_along_axis(lp, labels[:, e:e + 1], axis=-1)
        tot = tot - picked.sum()
    return tot


if __name__ == "__main__":
    key = jax.random.PRNGKey(0)
    k_emb, k_q, k_w, k_b, k_lab = jax.random.split(key, 5)

    # small shapes consistent with the module (exercises a multi-step grid: TS=8)
    batch_size = 3
    sents_per_doc = 16                # valid_sent_num per doc
    S = batch_size * sents_per_doc    # total sentences in NER batch
    T = 16                            # tokens per sentence
    H = 32                            # config.hidden_size
    E = 3                             # number of event types

    valid_sent_num_list = [sents_per_doc] * batch_size
    config = {"loss_lambda": 0.05, "loss_gamma": 1.0}

    # synthetic NER encoder outputs (external NERModel not part of this module's math);
    # fed as bf16: the reducer is memory-bound, so halving HBM bytes is the main win.
    emb_f32 = jax.random.normal(k_emb, (S, T, H), dtype=jnp.float32)
    ner_token_emb = emb_f32.astype(jnp.bfloat16)
    # masks: last 3 tokens of every sentence are padding
    ner_token_masks = jnp.concatenate(
        [jnp.ones((S, T - 3), jnp.float32), jnp.zeros((S, 3), jnp.float32)],
        axis=1).astype(jnp.bfloat16)

    # deterministic parameter init
    params = {
        "att_fc_w": 0.1 * jax.random.normal(k_q, (1, H), dtype=jnp.float32),  # Linear(H,1,bias=False).weight
        "ln_gamma": jnp.ones((1, H), jnp.float32),
        "ln_beta": jnp.zeros((1, H), jnp.float32),
        # event cls Linear(H,2) per event, packed as [H, 2*E] (= weight_e.T side by side)
        "ev_w": 0.1 * jax.random.normal(k_w, (H, 2 * E), dtype=jnp.float32),
        "ev_b": 0.1 * jax.random.normal(k_b, (1, 2 * E), dtype=jnp.float32),
        "num_events": E,
    }

    # doc_fea.doc_sent_labels per doc: [sents_per_doc, E] in {0, 1}
    doc_sent_labels_list = [
        jax.random.randint(jax.random.fold_in(k_lab, bi),
                           (sents_per_doc, E), 0, 2, dtype=jnp.int32)
        for bi in range(batch_size)
    ]
    # placeholder per-sentence NER losses (external NERModel)
    doc_sent_loss_list = [jnp.zeros((sents_per_doc,), jnp.float32)
                          for _ in range(batch_size)]

    mix_loss, sent_emb, ev_losses = dcfee_forward(
        ner_token_emb, ner_token_masks, valid_sent_num_list,
        doc_sent_labels_list, doc_sent_loss_list, params, config)
    jax.block_until_ready(mix_loss)

    # correctness check against pure-JAX references (same bf16-quantized inputs);
    # tolerances account for bf16 MXU operands (q and softmax weights in bf16).
    x32 = ner_token_emb.astype(jnp.float32)
    m32 = ner_token_masks.astype(jnp.float32)
    se_ref = ref_sent_emb(x32, m32, params["att_fc_w"],
                          params["ln_gamma"], params["ln_beta"])
    np.testing.assert_allclose(np.asarray(sent_emb), np.asarray(se_ref),
                               rtol=2e-2, atol=2e-2)

    ev_refs = [
        ref_event_loss(se_ref[bi * sents_per_doc:(bi + 1) * sents_per_doc],
                       params["ev_w"], params["ev_b"], doc_sent_labels_list[bi], E)
        for bi in range(batch_size)
    ]
    np.testing.assert_allclose(np.asarray(jnp.stack(ev_losses)),
                               np.asarray(jnp.stack(ev_refs)), rtol=1e-2, atol=1e-1)
    mix_ref = (1.0 / batch_size) * (1.0 - config["loss_lambda"]) * sum(ev_refs)
    np.testing.assert_allclose(float(mix_loss), float(mix_ref), rtol=1e-2, atol=1e-1)

    print("KERNEL_OK")
</pallas_src>

<mosaic_0001>
module attributes {stable_mosaic.version = 11 : i64} {
  func.func @_dcfee_fused_kernel(%arg0: i32, %arg1: memref<8x16x32xbf16, #tpu.memory_space<vmem>>, %arg2: memref<8x1x16xf32, #tpu.memory_space<vmem>>, %arg3: memref<1x1x32xbf16, #tpu.memory_space<vmem>>, %arg4: memref<1x32xf32, #tpu.memory_space<vmem>>, %arg5: memref<1x32xf32, #tpu.memory_space<vmem>>, %arg6: memref<32x3xf32, #tpu.memory_space<vmem>>, %arg7: memref<1x3xf32, #tpu.memory_space<vmem>>, %arg8: memref<8x3xi32, #tpu.memory_space<vmem>>, %arg9: memref<8x32xf32, #tpu.memory_space<vmem>>, %arg10: memref<8x1xf32, #tpu.memory_space<vmem>>) attributes {dimension_semantics = [#tpu.dimension_semantics<parallel>], iteration_bounds = array<i64: 6>, scalar_prefetch = 0 : i64, scratch_operands = 0 : i64, tpu.core_type = #tpu.core_type<tc>, window_params = [{transform_indices = @transform_0, window_bounds = array<i64: 8, 16, 32>}, {transform_indices = @transform_1, window_bounds = array<i64: 8, 1, 16>}, {pipeline_mode = #tpu.pipeline_mode<synchronous>, transform_indices = @transform_2, window_bounds = array<i64: 1, 1, 32>}, {pipeline_mode = #tpu.pipeline_mode<synchronous>, transform_indices = @transform_3, window_bounds = array<i64: 1, 32>}, {pipeline_mode = #tpu.pipeline_mode<synchronous>, transform_indices = @transform_4, window_bounds = array<i64: 1, 32>}, {pipeline_mode = #tpu.pipeline_mode<synchronous>, transform_indices = @transform_5, window_bounds = array<i64: 32, 3>}, {pipeline_mode = #tpu.pipeline_mode<synchronous>, transform_indices = @transform_6, window_bounds = array<i64: 1, 3>}, {transform_indices = @transform_7, window_bounds = array<i64: 8, 3>}, {transform_indices = @transform_8, window_bounds = array<i64: 8, 32>}, {transform_indices = @transform_9, window_bounds = array<i64: 8, 1>}]} {
    %c0 = arith.constant 0 : index
    %c0_0 = arith.constant 0 : index
    %c0_1 = arith.constant 0 : index
    %0 = vector.load %arg1[%c0, %c0_0, %c0_1] : memref<8x16x32xbf16, #tpu.memory_space<vmem>>, vector<8x16x32xbf16>
    %c0_2 = arith.constant 0 : index
    %c0_3 = arith.constant 0 : index
    %c0_4 = arith.constant 0 : index
    %1 = vector.load %arg3[%c0_2, %c0_3, %c0_4] : memref<1x1x32xbf16, #tpu.memory_space<vmem>>, vector<1x1x32xbf16>
    %2 = vector.shape_cast %1 : vector<1x1x32xbf16> to vector<1x1x32xbf16>
    %3 = vector.broadcast %2 : vector<1x1x32xbf16> to vector<8x1x32xbf16>
    "tpu.trace_start"() <{level = 10 : i32, message = "bqd,bkd->bqk"}> : () -> ()
    %cst = arith.constant dense<0.000000e+00> : vector<8x1x16xf32>
    %4 = tpu.matmul %3, %0, %cst {dimension_numbers = #tpu.dot_dimension_numbers<[2], [2], [1], [1], [0, 0, 0, 1, 1, 1], [0], [0]>} : vector<8x1x32xbf16>, vector<8x16x32xbf16>, vector<8x1x16xf32> -> vector<8x1x16xf32>
    "tpu.trace_stop"() : () -> ()
    %c0_5 = arith.constant 0 : index
    %c0_6 = arith.constant 0 : index
    %c0_7 = arith.constant 0 : index
    %5 = vector.load %arg2[%c0_5, %c0_6, %c0_7] : memref<8x1x16xf32, #tpu.memory_space<vmem>>, vector<8x1x16xf32>
    %6 = arith.addf %4, %5 : vector<8x1x16xf32>
    %cst_8 = arith.constant dense<0xFF800000> : vector<8x1xf32>
    %7 = vector.multi_reduction <maximumf>, %6, %cst_8 [2] : vector<8x1x16xf32> to vector<8x1xf32>
    %8 = vector.shape_cast %7 : vector<8x1xf32> to vector<8x1x1xf32>
    %9 = vector.broadcast %8 : vector<8x1x1xf32> to vector<8x1x16xf32>
    %10 = arith.subf %6, %9 : vector<8x1x16xf32>
    %11 = math.exp %10 : vector<8x1x16xf32>
    %cst_9 = arith.constant dense<0.000000e+00> : vector<8x1xf32>
    %12 = vector.multi_reduction <add>, %11, %cst_9 [2] : vector<8x1x16xf32> to vector<8x1xf32>
    %13 = vector.shape_cast %12 : vector<8x1xf32> to vector<8x1x1xf32>
    %14 = tpu.reciprocal %13 {approx = true} : vector<8x1x1xf32> -> vector<8x1x1xf32>
    %15 = vector.broadcast %14 : vector<8x1x1xf32> to vector<8x1x16xf32>
    %16 = arith.mulf %11, %15 : vector<8x1x16xf32>
    %17 = arith.truncf %16 : vector<8x1x16xf32> to vector<8x1x16xbf16>
    "tpu.trace_start"() <{level = 10 : i32, message = "bqk,bkd->bqd"}> : () -> ()
    %cst_10 = arith.constant dense<0.000000e+00> : vector<8x1x32xf32>
    %18 = tpu.matmul %17, %0, %cst_10 {dimension_numbers = #tpu.dot_dimension_numbers<[2], [1], [1], [2], [0, 0, 0, 1, 1, 2], [0], [0]>} : vector<8x1x16xbf16>, vector<8x16x32xbf16>, vector<8x1x32xf32> -> vector<8x1x32xf32>
    "tpu.trace_stop"() : () -> ()
    %19 = vector.shape_cast %18 : vector<8x1x32xf32> to vector<8x32xf32>
    %cst_11 = arith.constant dense<0.000000e+00> : vector<8xf32>
    %20 = vector.multi_reduction <add>, %19, %cst_11 [1] : vector<8x32xf32> to vector<8xf32>
    %21 = vector.shape_cast %20 : vector<8xf32> to vector<8x1xf32>
    %cst_12 = arith.constant 3.200000e+01 : f32
    %22 = vector.broadcast %cst_12 : f32 to vector<8x1xf32>
    %23 = arith.divf %21, %22 : vector<8x1xf32>
    %24 = vector.broadcast %23 : vector<8x1xf32> to vector<8x32xf32>
    %25 = arith.subf %19, %24 : vector<8x32xf32>
    %26 = arith.mulf %25, %25 : vector<8x32xf32>
    %cst_13 = arith.constant dense<0.000000e+00> : vector<8xf32>
    %27 = vector.multi_reduction <add>, %26, %cst_13 [1] : vector<8x32xf32> to vector<8xf32>
    %28 = vector.shape_cast %27 : vector<8xf32> to vector<8x1xf32>
    %cst_14 = arith.constant 3.100000e+01 : f32
    %29 = vector.broadcast %cst_14 : f32 to vector<8x1xf32>
    %30 = arith.divf %28, %29 : vector<8x1xf32>
    %31 = math.sqrt %30 : vector<8x1xf32>
    %cst_15 = arith.constant 9.99999997E-7 : f32
    %32 = vector.broadcast %cst_15 : f32 to vector<8x1xf32>
    %33 = arith.addf %31, %32 : vector<8x1xf32>
    %34 = tpu.reciprocal %33 : vector<8x1xf32> -> vector<8x1xf32>
    %c0_16 = arith.constant 0 : index
    %c0_17 = arith.constant 0 : index
    %35 = vector.load %arg4[%c0_16, %c0_17] : memref<1x32xf32, #tpu.memory_space<vmem>>, vector<1x32xf32>
    %36 = vector.broadcast %23 : vector<8x1xf32> to vector<8x32xf32>
    %37 = arith.subf %19, %36 : vector<8x32xf32>
    %38 = vector.broadcast %35 : vector<1x32xf32> to vector<8x32xf32>
    %39 = arith.mulf %38, %37 : vector<8x32xf32>
    %40 = vector.broadcast %34 : vector<8x1xf32> to vector<8x32xf32>
    %41 = arith.mulf %39, %40 : vector<8x32xf32>
    %c0_18 = arith.constant 0 : index
    %c0_19 = arith.constant 0 : index
    %42 = vector.load %arg5[%c0_18, %c0_19] : memref<1x32xf32, #tpu.memory_space<vmem>>, vector<1x32xf32>
    %43 = vector.broadcast %42 : vector<1x32xf32> to vector<8x32xf32>
    %44 = arith.addf %41, %43 : vector<8x32xf32>
    %c0_20 = arith.constant 0 : index
    %c0_21 = arith.constant 0 : index
    %45 = vector.load %arg9[%c0_20, %c0_21] : memref<8x32xf32, #tpu.memory_space<vmem>>, vector<8x32xf32>
    tpu.vector_store %arg9[%c0_20, %c0_21], %44 {strides = array<i32>} : memref<8x32xf32, #tpu.memory_space<vmem>>, vector<8x32xf32>,
    %c0_22 = arith.constant 0 : index
    %c0_23 = arith.constant 0 : index
    %46 = vector.load %arg6[%c0_22, %c0_23] : memref<32x3xf32, #tpu.memory_space<vmem>>, vector<32x3xf32>
    %cst_24 = arith.constant dense<0.000000e+00> : vector<8x3xf32>
    %47 = tpu.matmul %44, %46, %cst_24 {dimension_numbers = #tpu.dot_dimension_numbers<[1], [0], [0], [1], [0, 0, 1, 1], [], []>} : vector<8x32xf32>, vector<32x3xf32>, vector<8x3xf32> -> vector<8x3xf32>
    %c0_25 = arith.constant 0 : index
    %c0_26 = arith.constant 0 : index
    %48 = vector.load %arg7[%c0_25, %c0_26] : memref<1x3xf32, #tpu.memory_space<vmem>>, vector<1x3xf32>
    %49 = vector.broadcast %48 : vector<1x3xf32> to vector<8x3xf32>
    %50 = arith.addf %47, %49 : vector<8x3xf32>
    %c0_27 = arith.constant 0 : index
    %c0_28 = arith.constant 0 : index
    %51 = vector.load %arg8[%c0_27, %c0_28] : memref<8x3xi32, #tpu.memory_space<vmem>>, vector<8x3xi32>
    %c2_i32 = arith.constant 2 : i32
    %52 = vector.broadcast %c2_i32 : i32 to vector<8x3xi32>
    %53 = arith.muli %52, %51 : vector<8x3xi32>
    %c1_i32 = arith.constant 1 : i32
    %54 = vector.broadcast %c1_i32 : i32 to vector<8x3xi32>
    %55 = arith.subi %54, %53 : vector<8x3xi32>
    %56 = arith.sitofp %55 : vector<8x3xi32> to vector<8x3xf32>
    %57 = arith.mulf %56, %50 : vector<8x3xf32>
    %cst_29 = arith.constant 0.000000e+00 : f32
    %58 = vector.broadcast %cst_29 : f32 to vector<8x3xf32>
    %59 = arith.maximumf %57, %58 : vector<8x3xf32>
    %60 = math.absf %57 : vector<8x3xf32>
    %cst_30 = arith.constant 0.000000e+00 : f32
    %61 = vector.broadcast %cst_30 : f32 to vector<8x3xf32>
    %62 = arith.subf %61, %60 : vector<8x3xf32>
    %63 = math.exp %62 : vector<8x3xf32>
    %cst_31 = arith.constant 1.000000e+00 : f32
    %64 = vector.broadcast %cst_31 : f32 to vector<8x3xf32>
    %65 = arith.addf %64, %63 : vector<8x3xf32>
    %66 = math.log %65 : vector<8x3xf32>
    %67 = arith.addf %59, %66 : vector<8x3xf32>
    %cst_32 = arith.constant dense<0.000000e+00> : vector<8xf32>
    %68 = vector.multi_reduction <add>, %67, %cst_32 [1] : vector<8x3xf32> to vector<8xf32>
    %69 = vector.shape_cast %68 : vector<8xf32> to vector<8x1xf32>
    %c0_33 = arith.constant 0 : index
    %c0_34 = arith.constant 0 : index
    %70 = vector.load %arg10[%c0_33, %c0_34] : memref<8x1xf32, #tpu.memory_space<vmem>>, vector<8x1xf32>
    tpu.vector_store %arg10[%c0_33, %c0_34], %69 {strides = array<i32>} : memref<8x1xf32, #tpu.memory_space<vmem>>, vector<8x1xf32>,
    return
  }
  func.func @transform_0(%arg0: i32) -> (i32, i32, i32) {
    %c0_i32 = arith.constant 0 : i32
    %c0_i32_0 = arith.constant 0 : i32
    %c0_i32_1 = arith.constant 0 : i32
    return %arg0, %c0_i32, %c0_i32_0 : i32, i32, i32
  }
  func.func @transform_1(%arg0: i32) -> (i32, i32, i32) {
    %c0_i32 = arith.constant 0 : i32
    %c0_i32_0 = arith.constant 0 : i32
    %c0_i32_1 = arith.constant 0 : i32
    return %arg0, %c0_i32, %c0_i32_0 : i32, i32, i32
  }
  func.func @transform_2(%arg0: i32) -> (i32, i32, i32) {
    %c0_i32 = arith.constant 0 : i32
    %c0_i32_0 = arith.constant 0 : i32
    %c0_i32_1 = arith.constant 0 : i32
    %c0_i32_2 = arith.constant 0 : i32
    return %c0_i32, %c0_i32_0, %c0_i32_1 : i32, i32, i32
  }
  func.func @transform_3(%arg0: i32) -> (i32, i32) {
    %c0_i32 = arith.constant 0 : i32
    %c0_i32_0 = arith.constant 0 : i32
    %c0_i32_1 = arith.constant 0 : i32
    return %c0_i32, %c0_i32_0 : i32, i32
  }
  func.func @transform_4(%arg0: i32) -> (i32, i32) {
    %c0_i32 = arith.constant 0 : i32
    %c0_i32_0 = arith.constant 0 : i32
    %c0_i32_1 = arith.constant 0 : i32
    return %c0_i32, %c0_i32_0 : i32, i32
  }
  func.func @transform_5(%arg0: i32) -> (i32, i32) {
    %c0_i32 = arith.constant 0 : i32
    %c0_i32_0 = arith.constant 0 : i32
    %c0_i32_1 = arith.constant 0 : i32
    return %c0_i32, %c0_i32_0 : i32, i32
  }
  func.func @transform_6(%arg0: i32) -> (i32, i32) {
    %c0_i32 = arith.constant 0 : i32
    %c0_i32_0 = arith.constant 0 : i32
    %c0_i32_1 = arith.constant 0 : i32
    return %c0_i32, %c0_i32_0 : i32, i32
  }
  func.func @transform_7(%arg0: i32) -> (i32, i32) {
    %c0_i32 = arith.constant 0 : i32
    %c0_i32_0 = arith.constant 0 : i32
    return %arg0, %c0_i32 : i32, i32
  }
  func.func @transform_8(%arg0: i32) -> (i32, i32) {
    %c0_i32 = arith.constant 0 : i32
    %c0_i32_0 = arith.constant 0 : i32
    return %arg0, %c0_i32 : i32, i32
  }
  func.func @transform_9(%arg0: i32) -> (i32, i32) {
    %c0_i32 = arith.constant 0 : i32
    %c0_i32_0 = arith.constant 0 : i32
    return %arg0, %c0_i32 : i32, i32
  }
}

</mosaic_0001>

<bundles_post_ra>
// kernel: tpu_custom_call.1
= control target key start
LH: loop header
LB: loop body
LE: loop exit
PB: predicated region body
PF: predicated region fallthrough
CT: control target
= control target key end

     0   :  { %s1906_s30 = smov 0   ;;  %s2153_s0 = inlined_call_operand.vmem [shape: bf16[48,16,32], index: 0, kind: input, shape index: {}]   ;;  %s2154_s1 = inlined_call_operand.vmem [shape: f32[48,1,16], index: 1, kind: input, shape index: {}]   ;;  %s2155_s2 = inlined_call_operand.vmem [shape: bf16[1,1,32], index: 2, kind: input, shape index: {}]   ;;  %s2156_s3 = inlined_call_operand.vmem [shape: f32[1,32], index: 3, kind: input, shape index: {}]   ;;  %s2157_s4 = inlined_call_operand.vmem [shape: f32[1,32], index: 4, kind: input, shape index: {}]   ;;  %s2158_s5 = inlined_call_operand.vmem [shape: f32[32,3], index: 5, kind: input, shape index: {}]   ;;  %s2159_s6 = inlined_call_operand.vmem [shape: f32[1,3], index: 6, kind: input, shape index: {}]   ;;  %s2160_s7 = inlined_call_operand.vmem [shape: s32[48,3], index: 7, kind: input, shape index: {}]   ;;  %s2161_s8 = inlined_call_operand.vmem [shape: f32[48,32], index: 8, kind: output, shape index: {0}]   ;;  %s2162_s9 = inlined_call_operand.vmem [shape: f32[48,1], index: 9, kind: output, shape index: {1}]  }
   0x1 LB: > { %s1912_s10 = sadd.s32 4294967295, %s1852_s30   ;;  %p1605_p0 = scmp.ge.s32.totalorder %s1852_s30, 1  ;;  %s1852_s30 = sphi %s1906_s30, %s20_s30  }
   0x2   : > { %p311_p1 = scmp.lt.s32.totalorder %s1852_s30, 7 }
   0x4   : > { %p312_p2 = pnand %p1605_p0, %p311_p1 }
   0x5   : > { %s1606_s11 = sshll.u32 (!%p312_p2), %s1912_s10, 3  ;;  %p371_p4 = scmp.lt.s32.totalorder (!%p312_p2), %s1912_s10, 5 }
   0x6   : > { %315 = sbr.rel (%p312_p2) target bundleno = 1468 (0x5bc), region = 52  ;;  %p360_p3 = scmp.lt.s32.totalorder (!%p312_p2), %s1606_s11, 47 }
   0xb   : > { %v1854_v0 = vmov 0.0   ;;  %vm1855_vm0 = vmmov 0   ;;  %s2164_s11 = smov (!%p360_p3, %s1606_s11), 47  ;;  %vm414_vm1 = vcmask 261120   ;;  %v400_v7 = vld [vmem:[%s2155_s2] sm:$0x1] }
   0xc   : > { %1681 = vmatprep.subr.bf16.mxu0 %v1854_v0  ;;  %1687 = vmatprep.subr.bf16.mxu1 %v1854_v0  ;;  %s1643_s12 = sshll.u32 %s2164_s11, 3  ;;  %s2006_s20 = scalar_lea.vmem %s2154_s1, %s2164_s11  ;;  %vm797_vm2 = vcmask 122880   ;;  %vm895_vm3 = vcmask 130048   ;;  %vm1256_vm4 = vcmask 1041409   ;;  %vm1259_vm5 = vcmask 1042434  }
   0xd   : > { %1683 = vmatprep.mubr.msk.bf16.mxu0 %vm1855_vm0, %v1854_v0  ;;  %1689 = vmatprep.mubr.msk.bf16.mxu1 %vm1855_vm0, %v1854_v0  ;;  %s1929_s15 = scalar_lea.vmem %s2153_s0, %s1643_s12  ;;  %v401_v18 = vld [vmem:[%s2006_s20] sm:$0x1]  ;;  %v402_v19 = vld [vmem:[%s2006_s20 + $0x1] sm:$0x1]  ;;  %v403_v31 = vld [vmem:[%s2006_s20 + $0x2] sm:$0x1] }
   0xe   : > { %v1798_v1 = vld [vmem:[%s1929_s15] sm:$0xff]   ;;  %v1799_v2 = vld [vmem:[%s1929_s15 + $0x8] sm:$0xff]   ;;  %v1937_v5 = vld [vmem:[%s1929_s15 + $0x10] sm:$0xff]   ;;  %vm1262_vm6 = vcmask 1043459   ;;  %vm1265_vm7 = vcmask 1044484   ;;  %vm1268_vm8 = vcmask 1045509  }
   0xf   : > { %v419_v3 = vsel %vm414_vm1, %v1798_v1, 0  ;;  %v467_v4 = vsel %vm414_vm1, %v1799_v2, 0  ;;  %v1941_v6 = vld [vmem:[%s1929_s15 + $0x18] sm:$0xff]   ;;  %v515_v8 = vsel %vm414_vm1, %v1937_v5, 0  ;;  %v1955_v10 = vld [vmem:[%s1929_s15 + $0x20] sm:$0xff]   ;;  %v1961_v11 = vld [vmem:[%s1929_s15 + $0x28] sm:$0xff]  }
  0x10   : > { %1682 = vmatpush3.bf16.xpose.msra.mxu0 %v419_v3  ;;  %1688 = vmatpush3.bf16.xpose.msra.mxu1 %v467_v4  ;;  %v563_v9 = vsel %vm414_vm1, %v1941_v6, 0  ;;  %v611_v12 = vsel %vm414_vm1, %v1955_v10, 0  ;;  %v659_v13 = vsel %vm414_vm1, %v1961_v11, 0  ;;  %v1973_v14 = vld [vmem:[%s1929_s15 + $0x30] sm:$0xff]   ;;  %v1979_v15 = vld [vmem:[%s1929_s15 + $0x38] sm:$0xff]   ;;  %vm1271_vm9 = vcmask 1046534  }
  0x11   : > { %1693 = vmatprep.subr.bf16.mxu0 %v1854_v0  ;;  %1699 = vmatprep.subr.bf16.mxu1 %v1854_v0  ;;  %v707_v16 = vsel %vm414_vm1, %v1973_v14, 0  ;;  %v755_v17 = vsel %vm414_vm1, %v1979_v15, 0  ;;  %v404_v33 = vld [vmem:[%s2006_s20 + $0x3] sm:$0x1]  ;;  %v405_v45 = vld [vmem:[%s2006_s20 + $0x4] sm:$0x1] }
  0x12   : > { %v406_v47 = vld [vmem:[%s2006_s20 + $0x5] sm:$0x1]  ;;  %v407_v59 = vld [vmem:[%s2006_s20 + $0x6] sm:$0x1]  ;;  %v408_v61 = vld [vmem:[%s2006_s20 + $0x7] sm:$0x1] }
  0x13   : > { %vm1274_vm10 = vcmask 1047559   ;;  %s2166_s10 = smov (!%p371_p4, %s1912_s10), 5  ;;  %vm1490_vm13 = vcmask 23552   ;;  %vm1494_vm14 = vcmask 7168  }
  0x14   : > { %s2128_s12 = sshll.u32 %s2166_s10, 3 }
  0x15   : > { %s378_s17 = scalar_lea.vmem %s2161_s8, %s2128_s12  ;;  %s374_s19 = scalar_lea.vmem %s2160_s7, %s2128_s12 }
  0x16   : > { %s382_s24 = scalar_lea.vmem %s2162_s9, %s2128_s12 }
  0x17   : > { %1684 = vmatmul.mubr.msk.bf16.vlgmr.msra.gmra.mxu0 %vm414_vm1, %v400_v7  ;;  %1690 = vmatmul.mubr.msk.bf16.vlgmr.msra.gmra.mxu1 %vm414_vm1, %v400_v7 }
  0x18   : > { %1694 = vmatpush3.bf16.xpose.msra.mxu0 %v515_v8  ;;  %1700 = vmatpush3.bf16.xpose.msra.mxu1 %v563_v9 }
  0x19   : > { %1695 = vmatprep.mubr.msk.bf16.mxu0 %vm1855_vm0, %v1854_v0  ;;  %1701 = vmatprep.mubr.msk.bf16.mxu1 %vm1855_vm0, %v1854_v0 }
  0x1a   : > { %1705 = vmatprep.subr.bf16.mxu0 %v1854_v0  ;;  %1711 = vmatprep.subr.bf16.mxu1 %v1854_v0 }
  0x1f   : > { %1696 = vmatmul.mubr.msk.bf16.vlgmr.msra.gmra.mxu0 %vm414_vm1, %v400_v7  ;;  %1702 = vmatmul.mubr.msk.bf16.vlgmr.msra.gmra.mxu1 %vm414_vm1, %v400_v7 }
  0x20   : > { %1706 = vmatpush3.bf16.xpose.msra.mxu0 %v611_v12  ;;  %1712 = vmatpush3.bf16.xpose.msra.mxu1 %v659_v13 }
  0x21   : > { %1707 = vmatprep.mubr.msk.bf16.mxu0 %vm1855_vm0, %v1854_v0  ;;  %1713 = vmatprep.mubr.msk.bf16.mxu1 %vm1855_vm0, %v1854_v0 }
  0x22   : > { %1717 = vmatprep.subr.bf16.mxu0 %v1854_v0  ;;  %1723 = vmatprep.subr.bf16.mxu1 %v1854_v0 }
  0x27   : > { %1708 = vmatmul.mubr.msk.bf16.vlgmr.msra.gmra.mxu0 %vm414_vm1, %v400_v7  ;;  %1714 = vmatmul.mubr.msk.bf16.vlgmr.msra.gmra.mxu1 %vm414_vm1, %v400_v7 }
  0x28   : > { %1718 = vmatpush3.bf16.xpose.msra.mxu0 %v707_v16  ;;  %1724 = vmatpush3.bf16.xpose.msra.mxu1 %v755_v17 }
  0x29   : > { %1719 = vmatprep.mubr.msk.bf16.mxu0 %vm1855_vm0, %v1854_v0  ;;  %1725 = vmatprep.mubr.msk.bf16.mxu1 %vm1855_vm0, %v1854_v0 }
  0x2a   : > { %1729 = vmatprep.subr.bf16.mxu0 %v1854_v0  ;;  %1735 = vmatprep.subr.bf16.mxu1 %v1854_v0 }
  0x2f   : > { %1720 = vmatmul.mubr.msk.bf16.vlgmr.msra.gmra.mxu0 %vm414_vm1, %v400_v7  ;;  %1726 = vmatmul.mubr.msk.bf16.vlgmr.msra.gmra.mxu1 %vm414_vm1, %v400_v7 }
  0x30   : > { %1730 = vmatpush3.bf16.msra.mxu0 %v1798_v1  ;;  %1736 = vmatpush3.bf16.msra.mxu1 %v1799_v2 }
  0x31   : > { %1731 = vmatprep.mubr.msk.bf16.mxu0 %vm1855_vm0, %v1854_v0  ;;  %1737 = vmatprep.mubr.msk.bf16.mxu1 %vm1855_vm0, %v1854_v0 }
  0x32   : > { %1741 = vmatprep.subr.bf16.mxu0 %v1854_v0  ;;  %1747 = vmatprep.subr.bf16.mxu1 %v1854_v0 }
  0xd7   : > { %v455_v20 = vpop.f32.mrf.mxu0  ;;  %v503_v22 = vpop.f32.mrf.mxu1 }
  0xd8   : > { %v2010_v21 = vadd.f32 %v455_v20, %v401_v18  ;;  %v2012_v23 = vadd.f32 %v503_v22, %v402_v19 }
  0xd9   : > { %v1685_v24 = vpop.f32.mrf.mxu0  ;;  %v1691_v25 = vpop.f32.mrf.mxu1 }
  0xda   : > { %v798_v26 = vsel %vm797_vm2, %v2010_v21, -inf  ;;  %v801_v29 = vsel %vm797_vm2, %v2012_v23, -inf }
  0xdb   : > { %799 = vmax.xlane.f32.xlu0 %v798_v26  ;;  %v458_v27 = vpop.f32.mrf.mxu0  ;;  %v506_v28 = vpop.f32.mrf.mxu1 }
  0xdd   : > { %v1686_v30 = vpop.f32.mrf.mxu0  ;;  %v1692_v32 = vpop.f32.mrf.mxu1 }
  0xdf   : > { %802 = vmax.xlane.f32.xlu0 %v801_v29  ;;  %v551_v34 = vpop.f32.mrf.mxu0  ;;  %v599_v35 = vpop.f32.mrf.mxu1 }
  0xe0   : > { %v552_v36 = vadd.f32 %v551_v34, %v403_v31  ;;  %v600_v37 = vadd.f32 %v599_v35, %v404_v33 }
  0xe1   : > { %v1697_v38 = vpop.f32.mrf.mxu0  ;;  %v1703_v39 = vpop.f32.mrf.mxu1 }
  0xe2   : > { %v804_v40 = vsel %vm797_vm2, %v552_v36, -inf  ;;  %v807_v43 = vsel %vm797_vm2, %v600_v37, -inf }
  0xe3   : > { %805 = vmax.xlane.f32.xlu1 %v804_v40  ;;  %v554_v41 = vpop.f32.mrf.mxu0  ;;  %v602_v42 = vpop.f32.mrf.mxu1 }
  0xe5   : > { %v1698_v44 = vpop.f32.mrf.mxu0  ;;  %v1704_v46 = vpop.f32.mrf.mxu1 }
  0xe7   : > { %808 = vmax.xlane.f32.xlu1 %v807_v43  ;;  %v647_v48 = vpop.f32.mrf.mxu0  ;;  %v695_v49 = vpop.f32.mrf.mxu1 }
  0xe8   : > { %v648_v50 = vadd.f32 %v647_v48, %v405_v45  ;;  %v696_v51 = vadd.f32 %v695_v49, %v406_v47 }
  0xe9   : > { %v1709_v52 = vpop.f32.mrf.mxu0  ;;  %v1715_v53 = vpop.f32.mrf.mxu1 }
  0xea   : > { %v810_v54 = vsel %vm797_vm2, %v648_v50, -inf  ;;  %v813_v55 = vsel %vm797_vm2, %v696_v51, -inf }
  0xeb   : > { %811 = vmax.xlane.f32.xlu0 %v810_v54  ;;  %v650_v56 = vpop.f32.mrf.mxu0  ;;  %v698_v57 = vpop.f32.mrf.mxu1  ;;  %814 = vmax.xlane.f32.xlu1 %v813_v55 }
  0xed   : > { %v1710_v58 = vpop.f32.mrf.mxu0  ;;  %v1716_v60 = vpop.f32.mrf.mxu1 }
  0xef   : > { %v743_v62 = vpop.f32.mrf.mxu0  ;;  %v791_v1 = vpop.f32.mrf.mxu1 }
  0xf0   : > { %v744_v63 = vadd.f32 %v743_v62, %v407_v59  ;;  %v792_v2 = vadd.f32 %v791_v1, %v408_v61 }
  0xf1   : > { %v1721_v3 = vpop.f32.mrf.mxu0  ;;  %v1727_v4 = vpop.f32.mrf.mxu1 }
  0xf2   : > { %v816_v7 = vsel %vm797_vm2, %v744_v63, -inf  ;;  %v819_v8 = vsel %vm797_vm2, %v792_v2, -inf }
  0xf3   : > { %817 = vmax.xlane.f32.xlu0 %v816_v7  ;;  %v746_v9 = vpop.f32.mrf.mxu0  ;;  %v794_v12 = vpop.f32.mrf.mxu1  ;;  %820 = vmax.xlane.f32.xlu1 %v819_v8 }
  0xf5   : > { %v1722_v13 = vpop.f32.mrf.mxu0  ;;  %v1728_v16 = vpop.f32.mrf.mxu1 }
 0x164   : > { %v800_v17 = vpop.xlane.xlu0 %799 }
 0x165   : > { %v822_v18 = vsub.f32 %v2010_v21, %v800_v17 }
 0x167   : > { %v830_v19 = vmul.f32 1.442695, %v822_v18 }
 0x168   : > { %v803_v20 = vpop.xlane.xlu0 %802 }
 0x169   : > { %1806 = vpow2.f32 %v830_v19  ;;  %v823_v22 = vsub.f32 %v2012_v23, %v803_v20 }
 0x16b   : > { %v832_v24 = vmul.f32 1.442695, %v823_v22 }
 0x16c   : > { %v806_v25 = vpop.xlane.xlu1 %805 }
 0x16d   : > { %1808 = vpow2.f32 %v832_v24  ;;  %v824_v26 = vsub.f32 %v552_v36, %v806_v25 }
 0x16f   : > { %v834_v27 = vmul.f32 1.442695, %v824_v26 }
 0x170   : > { %v809_v28 = vpop.xlane.xlu1 %808 }
 0x171   : > { %1810 = vpow2.f32 %v834_v27  ;;  %v825_v29 = vsub.f32 %v600_v37, %v809_v28 }
 0x173   : > { %v836_v30 = vmul.f32 1.442695, %v825_v29 }
 0x174   : > { %v812_v31 = vpop.xlane.xlu0 %811  ;;  %v815_v32 = vpop.xlane.xlu1 %814 }
 0x175   : > { %1812 = vpow2.f32 %v836_v30  ;;  %v826_v33 = vsub.f32 %v648_v50, %v812_v31  ;;  %v827_v21 = vsub.f32 %v696_v51, %v815_v32 }
 0x176   : > { %v1807_v34 = vpop.eup %1806 }
 0x177   : > { %v838_v35 = vmul.f32 1.442695, %v826_v33  ;;  %v846_v38 = vsel %vm797_vm2, %v1807_v34, 0.0  ;;  %v840_v39 = vmul.f32 1.442695, %v827_v21 }
 0x178   : > { %847 = vadd.xlane.f32.xlu0 %v846_v38 }
 0x179   : > { %1814 = vpow2.f32 %v838_v35 }
 0x17a   : > { %v1809_v23 = vpop.eup %1808  ;;  %1816 = vpow2.f32 %v840_v39 }
 0x17b   : > { %v849_v36 = vsel %vm797_vm2, %v1809_v23, 0.0 }
 0x17c   : > { %850 = vadd.xlane.f32.xlu1 %v849_v36  ;;  %v818_v40 = vpop.xlane.xlu0 %817  ;;  %v821_v37 = vpop.xlane.xlu1 %820 }
 0x17d   : > { %v828_v41 = vsub.f32 %v744_v63, %v818_v40  ;;  %v829_v43 = vsub.f32 %v792_v2, %v821_v37 }
 0x17e   : > { %v1811_v42 = vpop.eup %1810 }
 0x17f   : > { %v842_v44 = vmul.f32 1.442695, %v828_v41  ;;  %v852_v45 = vsel %vm797_vm2, %v1811_v42, 0.0  ;;  %v844_v46 = vmul.f32 1.442695, %v829_v43 }
 0x180   : > { %853 = vadd.xlane.f32.xlu0 %v852_v45 }
 0x181   : > { %1818 = vpow2.f32 %v842_v44 }
 0x182   : > { %v1813_v47 = vpop.eup %1812  ;;  %1820 = vpow2.f32 %v844_v46 }
 0x183   : > { %v855_v48 = vsel %vm797_vm2, %v1813_v47, 0.0 }
 0x184   : > { %856 = vadd.xlane.f32.xlu1 %v855_v48 }
 0x186   : > { %v1815_v49 = vpop.eup %1814 }
 0x187   : > { %v1817_v50 = vpop.eup %1816  ;;  %v858_v51 = vsel %vm797_vm2, %v1815_v49, 0.0 }
 0x188   : > { %v861_v52 = vsel %vm797_vm2, %v1817_v50, 0.0  ;;  %859 = vadd.xlane.f32.xlu0 %v858_v51 }
 0x189   : > { %862 = vadd.xlane.f32.xlu1 %v861_v52 }
 0x18e   : > { %v2038_v53 = vpop.eup %1818 }
 0x18f   : > { %v2040_v54 = vpop.eup %1820  ;;  %v864_v55 = vsel %vm797_vm2, %v2038_v53, 0.0 }
 0x190   : > { %v867_v56 = vsel %vm797_vm2, %v2040_v54, 0.0  ;;  %865 = vadd.xlane.f32.xlu0 %v864_v55 }
 0x191   : > { %868 = vadd.xlane.f32.xlu1 %v867_v56 }
 0x201   : > { %v848_v57 = vpop.xlane.xlu0 %847 }
 0x202   : > { %1822 = vrcp.f32 %v848_v57 }
 0x205   : > { %v851_v58 = vpop.xlane.xlu1 %850 }
 0x206   : > { %1824 = vrcp.f32 %v851_v58 }
 0x209   : > { %v854_v59 = vpop.xlane.xlu0 %853 }
 0x20a   : > { %1826 = vrcp.f32 %v854_v59 }
 0x20d   : > { %v857_v60 = vpop.xlane.xlu1 %856 }
 0x20e   : > { %1828 = vrcp.f32 %v857_v60 }
 0x20f   : > { %v1823_v61 = vpop.eup %1822 }
 0x210   : > { %v878_v62 = vmul.f32 %v1823_v61, %v1807_v34 }
 0x211   : > { %v860_v63 = vpop.xlane.xlu0 %859 }
 0x212   : > { %v863_v1 = vpop.xlane.xlu1 %862  ;;  %1830 = vrcp.f32 %v860_v63  ;;  %v886_v2 = vpack.c.bf16 %v878_v62, %v878_v62 }
 0x213   : > { %v1825_v3 = vpop.eup %1824  ;;  %1832 = vrcp.f32 %v863_v1 }
 0x214   : > { %1732 = vmatmul.mubr.msk.bf16.vlgmr.msra.gmra.mxu0 %vm895_vm3, %v886_v2  ;;  %v879_v4 = vmul.f32 %v1825_v3, %v1809_v23 }
 0x215   : > { %1742 = vmatpush3.bf16.msra.mxu0 %v1937_v5  ;;  %1743 = vmatprep.mubr.msk.bf16.mxu0 %vm1855_vm0, %v1854_v0 }
 0x216   : > { %v887_v7 = vpack.c.bf16 %v879_v4, %v879_v4  ;;  %1753 = vmatprep.subr.bf16.mxu0 %v1854_v0 }
 0x217   : > { %v1827_v8 = vpop.eup %1826 }
 0x218   : > { %1738 = vmatmul.mubr.msk.bf16.vlgmr.msra.gmra.mxu1 %vm895_vm3, %v887_v7  ;;  %v880_v9 = vmul.f32 %v1827_v8, %v1811_v42 }
 0x219   : > { %1748 = vmatpush3.bf16.msra.mxu1 %v1941_v6  ;;  %v866_v12 = vpop.xlane.xlu0 %865  ;;  %1749 = vmatprep.mubr.msk.bf16.mxu1 %vm1855_vm0, %v1854_v0 }
 0x21a   : > { %v869_v13 = vpop.xlane.xlu1 %868  ;;  %1834 = vrcp.f32 %v866_v12  ;;  %v888_v16 = vpack.c.bf16 %v880_v9, %v880_v9  ;;  %1759 = vmatprep.subr.bf16.mxu1 %v1854_v0 }
 0x21b   : > { %v1829_v5 = vpop.eup %1828  ;;  %1836 = vrcp.f32 %v869_v13 }
 0x21c   : > { %1744 = vmatmul.mubr.msk.bf16.vlgmr.msra.gmra.mxu0 %vm895_vm3, %v888_v16  ;;  %v881_v17 = vmul.f32 %v1829_v5, %v1813_v47 }
 0x21d   : > { %1754 = vmatpush3.bf16.msra.mxu0 %v1955_v10  ;;  %1755 = vmatprep.mubr.msk.bf16.mxu0 %vm1855_vm0, %v1854_v0 }
 0x21e   : > { %v889_v6 = vpack.c.bf16 %v881_v17, %v881_v17  ;;  %1765 = vmatprep.subr.bf16.mxu0 %v1854_v0 }
 0x21f   : > { %v1831_v18 = vpop.eup %1830 }
 0x220   : > { %v1833_v19 = vpop.eup %1832  ;;  %1750 = vmatmul.mubr.msk.bf16.vlgmr.msra.gmra.mxu1 %vm895_vm3, %v889_v6  ;;  %v882_v20 = vmul.f32 %v1831_v18, %v1815_v49 }
 0x221   : > { %1760 = vmatpush3.bf16.msra.mxu1 %v1961_v11  ;;  %1761 = vmatprep.mubr.msk.bf16.mxu1 %vm1855_vm0, %v1854_v0  ;;  %v883_v24 = vmul.f32 %v1833_v19, %v1817_v50 }
 0x222   : > { %v890_v22 = vpack.c.bf16 %v882_v20, %v882_v20  ;;  %1771 = vmatprep.subr.bf16.mxu1 %v1854_v0 }
 0x223   : > { %v891_v10 = vpack.c.bf16 %v883_v24, %v883_v24 }
 0x224   : > { %1756 = vmatmul.mubr.msk.bf16.vlgmr.msra.gmra.mxu0 %vm895_vm3, %v890_v22 }
 0x225   : > { %1766 = vmatpush3.bf16.msra.mxu0 %v1973_v14  ;;  %1767 = vmatprep.mubr.msk.bf16.mxu0 %vm1855_vm0, %v1854_v0 }
 0x226   : > { %1777 = vmatprep.subr.mxu0 %v1854_v0 }
 0x227   : > { %v1835_v25 = vpop.eup %1834 }
 0x228   : > { %v1837_v26 = vpop.eup %1836  ;;  %1762 = vmatmul.mubr.msk.bf16.vlgmr.msra.gmra.mxu1 %vm895_vm3, %v891_v10  ;;  %v884_v11 = vmul.f32 %v1835_v25, %v2038_v53 }
 0x229   : > { %1772 = vmatpush3.bf16.msra.mxu1 %v1979_v15  ;;  %1773 = vmatprep.mubr.msk.bf16.mxu1 %vm1855_vm0, %v1854_v0  ;;  %v885_v14 = vmul.f32 %v1837_v26, %v2040_v54 }
 0x22a   : > { %v892_v27 = vpack.c.bf16 %v884_v11, %v884_v11 }
 0x22b   : > { %v893_v28 = vpack.c.bf16 %v885_v14, %v885_v14 }
 0x22c   : > { %1768 = vmatmul.mubr.msk.bf16.vlgmr.msra.gmra.mxu0 %vm895_vm3, %v892_v27 }
 0x22d   : > { %1785 = vmatprep.mubr.msk.f32.mxu0 %vm1855_vm0, %v1854_v0 }
 0x230   : > { %1774 = vmatmul.mubr.msk.bf16.vlgmr.msra.gmra.mxu1 %vm895_vm3, %v893_v28 }
 0x2d4   : > { %v2081_v29 = vpop.f32.mrf.mxu0 }
 0x2d6   : > { %v1733_v30 = vpop.f32.mrf.mxu0 }
 0x2d8   : > { %v936_v31 = vpop.f32.mrf.mxu0  ;;  %v977_v32 = vpop.f32.mrf.mxu1 }
 0x2d9   : > { %v1255_v46 = vrot.slane %v977_v32, 7 }
 0x2da   : > { %v1734_v15 = vpop.f32.mrf.mxu0  ;;  %v1739_v33 = vpop.f32.mrf.mxu1 }
 0x2db   : > { %v1257_v54 = vsel %vm1256_vm4, %v1255_v46, %v2081_v29 }
 0x2dc   : > { %v980_v34 = vpop.f32.mrf.mxu1  ;;  %v1021_v21 = vpop.f32.mrf.mxu0 }
 0x2dd   : > { %v1258_v47 = vrot.slane %v1021_v21, 6 }
 0x2de   : > { %v1740_v35 = vpop.f32.mrf.mxu1  ;;  %v1745_v38 = vpop.f32.mrf.mxu0 }
 0x2df   : > { %v1260_v56 = vsel %vm1259_vm5, %v1258_v47, %v1257_v54 }
 0x2e0   : > { %v1024_v39 = vpop.f32.mrf.mxu0  ;;  %v1065_v23 = vpop.f32.mrf.mxu1 }
 0x2e1   : > { %v1261_v50 = vrot.slane %v1065_v23, 5 }
 0x2e2   : > { %v1746_v36 = vpop.f32.mrf.mxu0  ;;  %v1751_v40 = vpop.f32.mrf.mxu1 }
 0x2e3   : > { %v1263_v60 = vsel %vm1262_vm6, %v1261_v50, %v1260_v56 }
 0x2e4   : > { %v1068_v37 = vpop.f32.mrf.mxu1  ;;  %v1109_v41 = vpop.f32.mrf.mxu0 }
 0x2e5   : > { %v1264_v51 = vrot.slane %v1109_v41, 4 }
 0x2e6   : > { %v1752_v42 = vpop.f32.mrf.mxu1  ;;  %v1757_v43 = vpop.f32.mrf.mxu0 }
 0x2e7   : > { %v1266_v61 = vsel %vm1265_vm7, %v1264_v51, %v1263_v60 }
 0x2e8   : > { %v1112_v44 = vpop.f32.mrf.mxu0  ;;  %v1153_v45 = vpop.f32.mrf.mxu1 }
 0x2e9   : > { %v1267_v55 = vrot.slane %v1153_v45, 3 }
 0x2ea   : > { %v1758_v48 = vpop.f32.mrf.mxu0  ;;  %v1763_v49 = vpop.f32.mrf.mxu1 }
 0x2eb   : > { %v1269_v2 = vsel %vm1268_vm8, %v1267_v55, %v1266_v61 }
 0x2ec   : > { %v1156_v52 = vpop.f32.mrf.mxu1  ;;  %v1197_v53 = vpop.f32.mrf.mxu0 }
 0x2ed   : > { %v1270_v57 = vrot.slane %v1197_v53, 2 }
 0x2ee   : > { %v1764_v58 = vpop.f32.mrf.mxu1  ;;  %v1769_v59 = vpop.f32.mrf.mxu0 }
 0x2ef   : > { %v1272_v7 = vsel %vm1271_vm9, %v1270_v57, %v1269_v2  ;;  %v1394_v2 = vld [vmem:[%s2158_s5 + $0x10] sm:$0xff] }
 0x2f0   : > { %v1200_v62 = vpop.f32.mrf.mxu0  ;;  %v1241_v63 = vpop.f32.mrf.mxu1 }
 0x2f1   : > { %v1273_v1 = vrot.slane %v1241_v63, 1 }
 0x2f2   : > { %v1770_v3 = vpop.f32.mrf.mxu0  ;;  %v1775_v4 = vpop.f32.mrf.mxu1 }
 0x2f3   : > { %v1275_v8 = vsel %vm1274_vm10, %v1273_v1, %v1272_v7  ;;  %v1395_v1 = vld [vmem:[%s2158_s5 + $0x18] sm:$0xff]  ;;  %v1393_v3 = vld [vmem:[%s2158_s5 + $0x8] sm:$0xff]  ;;  %v1392_v4 = vld [vmem:[%s2158_s5] sm:$0xff] }
 0x2f4   : > { %v1244_v9 = vpop.f32.mrf.mxu1  ;;  %v1277_v12 = vsel %vm414_vm1, %v1275_v8, 0.0  ;;  %1778 = vmatpush3.msra.mxu0 %v1395_v1 }
 0x2f5   : > { %1278 = vadd.xlane.f32.xlu0 %v1277_v12  ;;  %1779 = vmatprep.subr.mxu0 %v1854_v0 }
 0x2f6   : > { %v1776_v13 = vpop.f32.mrf.mxu1  ;;  %1780 = vmatpush3.msra.mxu0 %v1394_v2 }
 0x2f7   : > { %1781 = vmatprep.subr.mxu0 %v1854_v0 }
 0x2f8   : > { %1782 = vmatpush3.msra.mxu0 %v1393_v3 }
 0x2f9   : > { %1783 = vmatprep.subr.mxu0 %v1854_v0 }
 0x2fa   : > { %1784 = vmatpush3.msra.mxu0 %v1392_v4 }
 0x37e   : > { %v1279_v16 = vpop.xlane.xlu0 %1278 }
 0x37f   : > { %v1281_v5 = vmul.f32 0.03125, %v1279_v16 }
 0x381   : > { %v1283_v17 = vrot.slane %v1281_v5, 1  ;;  %v1284_v6 = vrot.slane %v1281_v5, 2  ;;  %v1285_v18 = vrot.slane %v1281_v5, 3  ;;  %v1286_v19 = vrot.slane %v1281_v5, 4 }
 0x382   : > { %v1287_v20 = vrot.slane %v1281_v5, 5  ;;  %v1288_v22 = vrot.slane %v1281_v5, 6  ;;  %v1289_v24 = vrot.slane %v1281_v5, 7  ;;  %v1298_v10 = vsub.f32 %v2081_v29, %v1281_v5 }
 0x383   : > { %v1299_v25 = vsub.f32 %v977_v32, %v1283_v17  ;;  %v1300_v26 = vsub.f32 %v1021_v21, %v1284_v6  ;;  %v1301_v11 = vsub.f32 %v1065_v23, %v1285_v18  ;;  %v1302_v27 = vsub.f32 %v1109_v41, %v1286_v19  ;;  %v1637_v6 = vld [vmem:[%s2156_s3] ss:$0 sm:$0xff] }
 0x384   : > { %v1303_v14 = vsub.f32 %v1153_v45, %v1287_v20  ;;  %v1304_v28 = vsub.f32 %v1197_v53, %v1288_v22  ;;  %v1305_v30 = vsub.f32 %v1241_v63, %v1289_v24  ;;  %v1306_v38 = vmul.f32 %v1298_v10, %v1298_v10  ;;  %v1638_v19 = vld [vmem:[%s2157_s4] ss:$0 sm:$0xff] }
 0x385   : > { %v1307_v31 = vmul.f32 %v1299_v25, %v1299_v25  ;;  %v1308_v15 = vmul.f32 %v1300_v26, %v1300_v26  ;;  %v1309_v33 = vmul.f32 %v1301_v11, %v1301_v11  ;;  %v1310_v34 = vmul.f32 %v1302_v27, %v1302_v27  ;;  %v1476_v24 = vld [vmem:[%s374_s19] sm:$0xff] }
 0x386   : > { %v1366_v35 = vrot.slane %v1299_v25, 7  ;;  %v1311_v39 = vmul.f32 %v1303_v14, %v1303_v14  ;;  %v1312_v37 = vmul.f32 %v1304_v28, %v1304_v28  ;;  %v1313_v29 = vmul.f32 %v1305_v30, %v1305_v30 }
 0x387   : > { %v1322_v36 = vrot.slane %v1307_v31, 7  ;;  %v1324_v40 = vrot.slane %v1308_v15, 6  ;;  %v1326_v21 = vrot.slane %v1309_v33, 5  ;;  %v1368_v23 = vrot.slane %v1300_v26, 6  ;;  %v1639_v26 = vld [vmem:[%s2159_s6] ss:$0 sm:$0xff] }
 0x388   : > { %v1367_v42 = vsel %vm1256_vm4, %v1366_v35, %v1298_v10  ;;  %v1328_v43 = vrot.slane %v1310_v34, 4  ;;  %v1370_v44 = vrot.slane %v1301_v11, 5  ;;  %v1330_v46 = vrot.slane %v1311_v39, 3 }
 0x389   : > { %v1323_v32 = vsel %vm1256_vm4, %v1322_v36, %v1306_v38  ;;  %v1369_v47 = vsel %vm1259_vm5, %v1368_v23, %v1367_v42  ;;  %v1372_v48 = vrot.slane %v1302_v27, 4  ;;  %v1332_v50 = vrot.slane %v1312_v37, 2 }
 0x38a   : > { %v1325_v41 = vsel %vm1259_vm5, %v1324_v40, %v1323_v32  ;;  %v1371_v51 = vsel %vm1262_vm6, %v1370_v44, %v1369_v47  ;;  %v1374_v52 = vrot.slane %v1303_v14, 3  ;;  %v1334_v54 = vrot.slane %v1313_v29, 1 }
 0x38b   : > { %v1327_v45 = vsel %vm1262_vm6, %v1326_v21, %v1325_v41  ;;  %v1373_v55 = vsel %vm1265_vm7, %v1372_v48, %v1371_v51  ;;  %v1376_v56 = vrot.slane %v1304_v28, 2  ;;  %v1378_v59 = vrot.slane %v1305_v30, 1 }
 0x38c   : > { %v1329_v49 = vsel %vm1265_vm7, %v1328_v43, %v1327_v45  ;;  %v1375_v58 = vsel %vm1268_vm8, %v1374_v52, %v1373_v55  ;;  %v1477_v10 = vmul.u32 2, %v1476_v24 }
 0x38d   : > { %v1331_v53 = vsel %vm1268_vm8, %v1330_v46, %v1329_v49  ;;  %v1377_v61 = vsel %vm1271_vm9, %v1376_v56, %v1375_v58 }
 0x38e   : > { %v1333_v57 = vsel %vm1271_vm9, %v1332_v50, %v1331_v53  ;;  %v1379_v63 = vsel %vm1274_vm10, %v1378_v59, %v1377_v61  ;;  %v1478_v25 = vsub.s32 1, %v1477_v10 }
 0x38f   : > { %v1335_v60 = vsel %vm1274_vm10, %v1334_v54, %v1333_v57  ;;  %v1381_v0 = vmul.f32 %v1637_v6, %v1379_v63 }
 0x390   : > { %v1337_v62 = vsel %vm414_vm1, %v1335_v60, 0.0  ;;  %v1479_v11 = vcvt.s32.f32 %v1478_v25 }
 0x391   : > { %1338 = vadd.xlane.f32.xlu1 %v1337_v62 }
 0x41a   : > { %v1339_v7 = vpop.xlane.xlu1 %1338 }
 0x41b   : > { %v1341_v8 = vmul.f32 0.032258064, %v1339_v7 }
 0x41d   : > { %1838 = vrsqrt.f32 %v1341_v8  ;;  %vm1344_vm11 = vcmp.eq.f32.partialorder %v1341_v8, inf  ;;  %v1347_v13 = vand.u32 2147483648, %v1341_v8  ;;  %vm1346_vm12 = vcmp.eq.f32.partialorder %v1341_v8, 0.0 }
 0x42a   : > { %v1839_v9 = vpop.eup %1838 }
 0x42b   : > { %v1343_v12 = vmul.f32 %v1839_v9, %v1341_v8 }
 0x42d   : > { %v1345_v16 = vsel %vm1344_vm11, %v1341_v8, %v1343_v12 }
 0x42e   : > { %v1348_v5 = vsel %vm1346_vm12, %v1347_v13, %v1345_v16 }
 0x42f   : > { %v1349_v17 = vadd.f32 1e-06, %v1348_v5 }
 0x431   : > { %1840 = vrcp.f32 %v1349_v17 }
 0x43e   : > { %v1841_v18 = vpop.eup %1840 }
 0x43f   : > { %v1382_v20 = vmul.f32 %v1841_v18, %v1381_v0 }
 0x441   : > { %v1390_v22 = vadd.f32 %v1638_v19, %v1382_v20 }
 0x443   : > { %1786 = vmatmul.mubr.msk.f32.vlgmr.msra.gmra.mxu0 %vm414_vm1, %v1390_v22  ;;  %1391 = vst.msk [vmem:[%s378_s17] sm:$0xff] %vm414_vm1, %v1390_v22 }
 0x503   : > { %v1472_v27 = vpop.f32.mrf.mxu0 }
 0x504   : > { %v1473_v14 = vadd.f32 %v1639_v26, %v1472_v27 }
 0x505   : > { %v1787_v28 = vpop.f32.mrf.mxu0 }
 0x506   : > { %v1480_v30 = vmul.f32 %v1479_v11, %v1473_v14 }
 0x508   : > { %v1482_v31 = vand.u32 2147483647, %v1480_v30  ;;  %v1481_v39 = vmax.f32 %v1480_v30, 0.0 }
 0x50a   : > { %v1483_v15 = vsub.f32 0.0, %v1482_v31 }
 0x50c   : > { %v1484_v33 = vmul.f32 1.442695, %v1483_v15 }
 0x50e   : > { %1842 = vpow2.f32 %v1484_v33 }
 0x51b   : > { %v1843_v34 = vpop.eup %1842 }
 0x51c   : > { %v1486_v35 = vadd.f32 1.0, %v1843_v34 }
 0x51e   : > { %1844 = vlog2.f32 %v1486_v35 }
 0x52b   : > { %v1845_v38 = vpop.eup %1844 }
 0x52c   : > { %v1488_v36 = vmul.f32 0.6931472, %v1845_v38 }
 0x52e   : > { %v1489_v40 = vadd.f32 %v1488_v36, %v1481_v39 }
 0x530   : > { %v1491_v37 = vsel %vm1490_vm13, %v1489_v40, 0.0 }
 0x531   : > { %1492 = vadd.xlane.f32.xlu0 %v1491_v37 }
 0x5ba   : > { %v1493_v42 = vpop.xlane.xlu0 %1492 }
 0x5bb   : > { %1495 = vst.msk [vmem:[%s382_s24] sm:$0xff] %vm1494_vm14, %v1493_v42 }
 0x5bc PF: > { %s20_s30 = sadd.s32 1, %s1852_s30  }
 0x5bd   : > { %p17_p5 = scmp.ge.s32.totalorder %s20_s30, 8  }
 0x5bf   :  { %19 = sbr.rel (!%p17_p5) target bundleno = 1 (0x1), region = 100 }

</bundles_post_ra>
